<compile_context>
chip_gen: v5e
topology: v5e:2x2
jax: 0.10.0
libtpu: 0.0.40
codegen_flags: <defaults>
</compile_context>

<pallas_src>
import functools

import jax
import jax.numpy as jnp
from jax.experimental import pallas as pl
from jax.experimental.pallas import tpu as pltpu

_SUBLANE = 8
_LANE = 128
# Conservative budget: well under the v5e 16 MiB scoped-VMEM default and the
# v7x 32 MiB default (of 64 MiB physical).
_VMEM_BUDGET_BYTES = 8 * 1024 * 1024


def _round_up(x, m):
    return ((x + m - 1) // m) * m


def _center_kernel_blockspec(x_ref, o_ref):
    # x_ref: (nb, 3, W, C) -- H already cropped to rows 3:6 by the BlockSpec
    #        (block size 3 along H, block index 1 -> elements 3:6).
    # o_ref: (nb, 3, 3, C) -- lane-dense output (C on the lane axis).
    # Only the W axis still needs slicing; no cross-lane movement in-kernel.
    o_ref[...] = x_ref[:, :, 3:6, :]


def _center_kernel_manual(x_hbm, o_ref, buf, sem, *, nb):
    # x_hbm: full (N, H, W, C) input left in HBM (memory_space=pl.ANY).
    # Copy only the 3x3 spatial crop for this batch block into VMEM, so input
    # HBM traffic is 9*C elements per batch element instead of 3*W*C.
    n0 = pl.program_id(0) * nb
    cp = pltpu.make_async_copy(
        x_hbm.at[pl.ds(n0, nb), pl.ds(3, 3), pl.ds(3, 3), :],
        buf,
        sem,
    )
    cp.start()
    cp.wait()
    o_ref[...] = buf[...]


def simple_model_forward(x, *, manual_dma_min_w=33):
    """Pallas implementation of SimpleModel.forward.

    x: (N, H, W, C) float32 (NHWC). Returns (N, C, 3, 3) float32 (NCHW),
    equal to x.permute(0, 3, 1, 2)[:, :, 3:6, 3:6] in PyTorch terms.
    """
    # TODO(synk): the PyTorch forward body is truncated (no `return`); we
    # return `center`, the last value it computes.
    N, H, W, C = x.shape
    assert H >= 6 and W >= 6, "center crop [3:6, 3:6] requires H, W >= 6"
    dtype_bytes = jnp.dtype(x.dtype).itemsize

    use_manual = W >= manual_dma_min_w
    lane_pad = _round_up(C, _LANE)

    # Per-batch-element VMEM footprint of the blocks, with (8,128) tile padding
    # (tiny minor dims pad heavily, so raw-byte estimates undercount).
    out_per_elem = 2 * 3 * _round_up(3, _SUBLANE) * lane_pad * dtype_bytes  # dbl-buffered
    if use_manual:
        buf_per_elem = 3 * _round_up(3, _SUBLANE) * lane_pad * dtype_bytes  # scratch
        per_elem = buf_per_elem + out_per_elem
    else:
        in_per_elem = 2 * 3 * _round_up(W, _SUBLANE) * lane_pad * dtype_bytes  # dbl-buffered
        per_elem = in_per_elem + out_per_elem

    # 1-2 grid steps by default (2 so v7x can use both TensorCores via the
    # "parallel" grid axis); grow the step count only if the padded blocks
    # would blow the VMEM budget.
    steps = 1 if N == 1 else 2
    while steps < N and pl.cdiv(N, steps) * per_elem > _VMEM_BUDGET_BYTES:
        steps *= 2
    steps = min(steps, N)

    out_shape = jax.ShapeDtypeStruct((N, 3, 3, C), x.dtype)
    cparams = pltpu.CompilerParams(dimension_semantics=("parallel",))

    if use_manual:
        # Manual DMA uses static copy sizes, so the batch block must divide N.
        while N % steps:
            steps += 1
        nb = N // steps
        center_nhwc = pl.pallas_call(
            functools.partial(_center_kernel_manual, nb=nb),
            out_shape=out_shape,
            grid=(steps,),
            in_specs=[pl.BlockSpec(memory_space=pl.ANY)],
            out_specs=pl.BlockSpec((nb, 3, 3, C), lambda n: (n, 0, 0, 0)),
            scratch_shapes=[
                pltpu.VMEM((nb, 3, 3, C), x.dtype),
                pltpu.SemaphoreType.DMA(()),
            ],
            compiler_params=cparams,
        )(x)
    else:
        nb = pl.cdiv(N, steps)
        center_nhwc = pl.pallas_call(
            _center_kernel_blockspec,
            out_shape=out_shape,
            grid=(pl.cdiv(N, nb),),
            in_specs=[
                # Crop H in the BlockSpec: block size 3 along H, block index 1
                # selects rows 3:6 (valid because the crop start 3 is an exact
                # multiple of the H block size).  Last two block dims (W, C)
                # are full-extent, so the (8,128) constraint is satisfied.
                pl.BlockSpec((nb, 3, W, C), lambda n: (n, 1, 0, 0)),
            ],
            out_specs=pl.BlockSpec((nb, 3, 3, C), lambda n: (n, 0, 0, 0)),
            compiler_params=cparams,
        )(x)

    # TODO(synk): the final NHWC->NCHW permute of the tiny (N,3,3,C) result is
    # left to XLA; an in-kernel permute needs a cross-lane relayout of 3x3xC
    # slivers whose Mosaic lowering is fragile at these sizes.  (For this op a
    # pure-XLA slice+transpose with no pallas_call is likely fastest of all and
    # should be the benchmark baseline.)
    return jnp.transpose(center_nhwc, (0, 3, 1, 2))


if __name__ == "__main__":
    key = jax.random.PRNGKey(0)
    k1, k2 = jax.random.split(key)

    def ref_fn(x):
        # Pure-JAX reference of the PyTorch semantics:
        # permute(0, 3, 1, 2) then [:, :, 3:6, 3:6]
        return jnp.transpose(x, (0, 3, 1, 2))[:, :, 3:6, 3:6]

    # Case 1: small W -> BlockSpec (H-cropped) path.  N=2, H=16, W=16, C=4.
    x1 = jax.random.normal(k1, (2, 16, 16, 4), dtype=jnp.float32)
    out1 = jax.block_until_ready(simple_model_forward(x1))
    assert out1.shape == (2, 4, 3, 3), out1.shape
    assert jnp.allclose(out1, ref_fn(x1)), "BlockSpec-path output mismatch"

    # Case 2: wide W -> manual-DMA path (crops W before VMEM).
    x2 = jax.random.normal(k2, (2, 8, 48, 4), dtype=jnp.float32)
    out2 = jax.block_until_ready(simple_model_forward(x2))
    assert out2.shape == (2, 4, 3, 3), out2.shape
    assert jnp.allclose(out2, ref_fn(x2)), "manual-DMA-path output mismatch"

    print("KERNEL_OK")
</pallas_src>

<mosaic_0001>
module attributes {stable_mosaic.version = 11 : i64} {
  func.func @_center_kernel_blockspec(%arg0: i32, %arg1: memref<1x3x16x4xf32, #tpu.memory_space<vmem>>, %arg2: memref<1x3x3x4xf32, #tpu.memory_space<vmem>>) attributes {dimension_semantics = [#tpu.dimension_semantics<parallel>], iteration_bounds = array<i64: 2>, scalar_prefetch = 0 : i64, scratch_operands = 0 : i64, tpu.core_type = #tpu.core_type<tc>, window_params = [{transform_indices = @transform_0, window_bounds = array<i64: 1, 3, 16, 4>}, {transform_indices = @transform_1, window_bounds = array<i64: 1, 3, 3, 4>}]} {
    %c0 = arith.constant 0 : index
    %c0_0 = arith.constant 0 : index
    %c3 = arith.constant 3 : index
    %c0_1 = arith.constant 0 : index
    %0 = vector.load %arg1[%c0, %c0_0, %c3, %c0_1] : memref<1x3x16x4xf32, #tpu.memory_space<vmem>>, vector<1x3x3x4xf32>
    %c0_2 = arith.constant 0 : index
    %c0_3 = arith.constant 0 : index
    %c0_4 = arith.constant 0 : index
    %c0_5 = arith.constant 0 : index
    %1 = vector.load %arg2[%c0_2, %c0_3, %c0_4, %c0_5] : memref<1x3x3x4xf32, #tpu.memory_space<vmem>>, vector<1x3x3x4xf32>
    tpu.vector_store %arg2[%c0_2, %c0_3, %c0_4, %c0_5], %0 {strides = array<i32>} : memref<1x3x3x4xf32, #tpu.memory_space<vmem>>, vector<1x3x3x4xf32>,
    return
  }
  func.func @transform_0(%arg0: i32) -> (i32, i32, i32, i32) {
    %c1_i32 = arith.constant 1 : i32
    %c0_i32 = arith.constant 0 : i32
    %c0_i32_0 = arith.constant 0 : i32
    %c0_i32_1 = arith.constant 0 : i32
    return %arg0, %c1_i32, %c0_i32, %c0_i32_0 : i32, i32, i32, i32
  }
  func.func @transform_1(%arg0: i32) -> (i32, i32, i32, i32) {
    %c0_i32 = arith.constant 0 : i32
    %c0_i32_0 = arith.constant 0 : i32
    %c0_i32_1 = arith.constant 0 : i32
    %c0_i32_2 = arith.constant 0 : i32
    return %arg0, %c0_i32, %c0_i32_0, %c0_i32_1 : i32, i32, i32, i32
  }
}

</mosaic_0001>

<bundles_post_ra>
// kernel: tpu_custom_call.1
= control target key start
LH: loop header
LB: loop body
LE: loop exit
PB: predicated region body
PF: predicated region fallthrough
CT: control target
= control target key end

     0   :  { %s215_s6 = smov 0   ;;  %s235_s0 = inlined_call_operand.vmem [shape: f32[2,16,16,4], index: 0, kind: input, shape index: {}]   ;;  %s236_s1 = inlined_call_operand.vmem [shape: f32[2,3,3,4], index: 1, kind: output, shape index: {}]  }
   0x1 LB: > { %s188_s7 = sadd.s32 4294967295, %s217_s6   ;;  %p192_p0 = scmp.ge.s32.totalorder %s217_s6, 1  ;;  %s217_s6 = sphi %s215_s6, %s11_s6  }
   0x2   : > { %p88_p1 = scmp.lt.s32.totalorder %s217_s6, 3 }
   0x4   : > { %p89_p2 = pnand %p192_p0, %p88_p1 }
   0x5   : > { %p109_p3 = scmp.lt.s32.totalorder (!%p89_p2), %s188_s7, 1 }
   0x6   : > { %92 = sbr.rel (%p89_p2) target bundleno = 18 (0x12), region = 24 }
   0xb   : > { %s238_s7 = smov (!%p109_p3, %s188_s7), 1  ;;  %vm123_vm0 = vcmask 26624  }
   0xc   : > { %s201_s8 = sshll.u32 %s238_s7, 8  ;;  %s202_s9 = smul.u32 12, %s238_s7 }
   0xd   : > { %s160_s12 = scalar_lea.vmem %s235_s0, %s201_s8 }
   0xe   : > { %s119_s15 = scalar_lea.vmem %s236_s1, %s202_s9  ;;  %v196_v0 = vld [vmem:[%s160_s12 + $0x33] sm:$0x7]  ;;  %v197_v1 = vld [vmem:[%s160_s12 + $0x43] sm:$0x7] }
   0xf   : > { %v198_v2 = vld [vmem:[%s160_s12 + $0x53] sm:$0x7]  ;;  %124 = vst.msk [vmem:[%s119_s15] sm:$0x7] %vm123_vm0, %v196_v0 }
  0x10   : > { %125 = vst.msk [vmem:[%s119_s15 + $0x4] sm:$0x7] %vm123_vm0, %v197_v1 }
  0x11   : > { %126 = vst.msk [vmem:[%s119_s15 + $0x8] sm:$0x7] %vm123_vm0, %v198_v2 }
  0x12 PF: > { %s11_s6 = sadd.s32 1, %s217_s6  }
  0x13   : > { %p8_p4 = scmp.ge.s32.totalorder %s11_s6, 4  }
  0x15   :  { %10 = sbr.rel (!%p8_p4) target bundleno = 1 (0x1), region = 54 }

</bundles_post_ra>
